<compile_context>
chip_gen: v7x
topology: tpu7x:2x2x1
jax: 0.10.0
libtpu: 0.0.40
codegen_flags: <defaults>
</compile_context>

<pallas_src>
import jax
import jax.numpy as jnp
from jax.experimental import pallas as pl
from jax.experimental.pallas import tpu as pltpu

HIDDE_SIZE_OUT = 8  # `hidde_size_out` global from the PyTorch module


def _round_up(n, m):
    return ((n + m - 1) // m) * m


# ----------------------------- Pallas kernels ------------------------------ #

def _critic_discr_kernel(x3_ref, w1t_ref, b1_ref, w2t_ref, b2_ref,
                         w3ot_ref, embot_ref, biasot_ref, out_ref):
    """Discrete-state CriticNet forward, batch on the lane axis.

    x3_ref:    (3, TB) f32   rows 0:2 = continuous features, row 2 = codes
    w1t_ref:   (H, 3)        layer-1 weights, zero column for the code row
    out_ref:   (out_size, TB)
    """
    x = x3_ref[...]                                           # (3, TB)

    # Layer 1 on the MXU (K=3; the discrete-code column's weight is zero).
    h = jnp.tanh(jnp.dot(w1t_ref[...], x,
                         preferred_element_type=jnp.float32) + b1_ref[...])

    # Layer 2 on the MXU: (H, H) @ (H, TB), lane-dense N.
    h = jnp.tanh(jnp.dot(w2t_ref[...], h,
                         preferred_element_type=jnp.float32) + b2_ref[...])

    # Folded (w3 -> wo) projection: (out, H) @ (H, TB).
    out = jnp.dot(w3ot_ref[...], h, preferred_element_type=jnp.float32)

    # Embedding (pre-folded through the output layer) via one-hot matmul.
    n_embed = embot_ref.shape[1]
    codes = jnp.clip(x[2:3, :].astype(jnp.int32), 0, n_embed - 1)  # (1, TB)
    iota = jax.lax.broadcasted_iota(jnp.int32, (n_embed, codes.shape[1]), 0)
    onehot = (iota == codes).astype(jnp.float32)              # (discr_size, TB)
    out = out + jnp.dot(embot_ref[...], onehot,
                        preferred_element_type=jnp.float32)

    out_ref[...] = out + biasot_ref[...]


def _critic_conti_kernel(x2_ref, w1t_ref, b1_ref, w2t_ref, b2_ref,
                         w3t_ref, b3_ref, out_ref):
    """Continuous-only CriticNet forward: MLP(2 -> H -> H -> out_size)."""
    h = jnp.tanh(jnp.dot(w1t_ref[...], x2_ref[...],
                         preferred_element_type=jnp.float32) + b1_ref[...])
    h = jnp.tanh(jnp.dot(w2t_ref[...], h,
                         preferred_element_type=jnp.float32) + b2_ref[...])
    out_ref[...] = (jnp.dot(w3t_ref[...], h,
                            preferred_element_type=jnp.float32) + b3_ref[...])


# ------------------------------ JAX wrapper -------------------------------- #

class CriticNetPallas:
    def __init__(self, state_size, out_size, discr_state_info, hidde_size,
                 key=jax.random.PRNGKey(0), tile_b_max=8192):
        self.state_size = state_size
        self.out_size = out_size
        self.is_discr_state, self.discr_size = discr_state_info
        self.hidde_size = hidde_size
        self._tile_b_max = tile_b_max

        in_dim = state_size - 1
        # forward() only consumes x[:, 0:2]; keep fan_in and the slice width tied.
        assert in_dim == 2, "CriticNet forward only uses x[:, 0:2]; state_size must be 3"

        ks = jax.random.split(key, 10)
        mlp_out = HIDDE_SIZE_OUT if self.is_discr_state else out_size

        def lin(kw, fan_in, fan_out):
            bound = 1.0 / jnp.sqrt(jnp.float32(fan_in))
            return jax.random.uniform(kw, (fan_in, fan_out), jnp.float32,
                                      -bound, bound)

        # make_seq(in_dim, mlp_out, hidde_size): Linear->Tanh->Linear->Tanh->Linear
        # (bias init here is uniform(-0.1, 0.1), a model-parity nit vs PyTorch's
        #  default +-1/sqrt(fan_in); kernel semantics are unaffected.)
        self.w1 = lin(ks[0], in_dim, hidde_size)
        self.b1 = jax.random.uniform(ks[1], (1, hidde_size), jnp.float32, -0.1, 0.1)
        self.w2 = lin(ks[2], hidde_size, hidde_size)
        self.b2 = jax.random.uniform(ks[3], (1, hidde_size), jnp.float32, -0.1, 0.1)
        self.w3 = lin(ks[4], hidde_size, mlp_out)
        self.b3 = jax.random.uniform(ks[5], (1, mlp_out), jnp.float32, -0.1, 0.1)

        # Transposed copies for the batch-on-lanes kernel layout.
        self.b1_t = self.b1.T            # (H, 1)
        self.w2_t = self.w2.T            # (H, H)
        self.b2_t = self.b2.T            # (H, 1)

        if self.is_discr_state:
            assert self.discr_size is not None
            assert self.discr_size < (1 << 24), \
                "codes are carried as f32; exact only below 2^24"
            # Layer-1 weights with an explicit zero column for the code row so
            # the whole (3, TB) input slab can feed one MXU matmul.
            self.w1_t = jnp.concatenate(
                [self.w1.T, jnp.zeros((hidde_size, 1), jnp.float32)], axis=1)  # (H, 3)
            self.emb = jax.random.normal(ks[6],
                                         (self.discr_size, HIDDE_SIZE_OUT),
                                         jnp.float32)
            self.wo = lin(ks[7], HIDDE_SIZE_OUT, out_size)
            self.bo = jax.random.uniform(ks[8], (1, out_size), jnp.float32,
                                         -0.1, 0.1)
            # Algebraic fold of (w3, emb, wo, b3, bo): no nonlinearity between them.
            self.w3o_t = (self.w3 @ self.wo).T                 # (out, H)
            self.emb_o_t = (self.emb @ self.wo).T              # (out, discr_size)
            self.bias_o_t = (self.b3 @ self.wo + self.bo).T    # (out, 1)
        else:
            self.w1_t = self.w1.T        # (H, 2)
            self.w3_t = self.w3.T        # (out, H)
            self.b3_t = self.b3.T        # (out, 1)

    # -- tiling ------------------------------------------------------------- #
    def _tiling(self, batch):
        num_tiles = pl.cdiv(batch, self._tile_b_max)
        tile_b = _round_up(pl.cdiv(batch, num_tiles), 128)
        # Keep >= 2 grid steps once the batch is big enough that the split pays
        # for its per-step overhead -> lets the "parallel" axis shard across the
        # 2 TensorCores on v7x (no-op / harmless on single-TC v5e/v6e).
        if num_tiles == 1 and batch >= 4096:
            num_tiles = 2
            tile_b = _round_up(pl.cdiv(batch, num_tiles), 128)
        b_pad = num_tiles * tile_b
        return num_tiles, tile_b, b_pad

    def __call__(self, x):
        batch = x.shape[0]
        if batch == 0:
            return jnp.zeros((0, self.out_size), jnp.float32)

        num_tiles, tile_b, b_pad = self._tiling(batch)
        pad = b_pad - batch

        if self.is_discr_state:
            # Single pre-transposed slab: conti cols + f32-encoded codes.
            xt = jnp.pad(x[:, 0:3].astype(jnp.float32).T,
                         ((0, 0), (0, pad)))                   # (3, b_pad)
            ncols = 3
            args = (xt, self.w1_t, self.b1_t, self.w2_t, self.b2_t,
                    self.w3o_t, self.emb_o_t, self.bias_o_t)
            kernel = _critic_discr_kernel
        else:
            xt = jnp.pad(x[:, 0:2].astype(jnp.float32).T,
                         ((0, 0), (0, pad)))                   # (2, b_pad)
            ncols = 2
            args = (xt, self.w1_t, self.b1_t, self.w2_t, self.b2_t,
                    self.w3_t, self.b3_t)
            kernel = _critic_conti_kernel

        def weight_spec(a):
            # Full block, constant index_map -> stays resident in VMEM.
            return pl.BlockSpec(tuple(a.shape), lambda i: (0, 0))

        in_specs = ([pl.BlockSpec((ncols, tile_b), lambda i: (0, i))]
                    + [weight_spec(a) for a in args[1:]])
        out_spec = pl.BlockSpec((self.out_size, tile_b), lambda i: (0, i))
        out_shape = jax.ShapeDtypeStruct((self.out_size, b_pad), jnp.float32)

        out_t = pl.pallas_call(
            kernel,
            out_shape=out_shape,
            grid=(num_tiles,),
            in_specs=in_specs,
            out_specs=out_spec,
            compiler_params=pltpu.CompilerParams(
                dimension_semantics=("parallel",)),
        )(*args)

        # Avoid a wrapper-side transpose of the (1, b_pad) output.
        if self.out_size == 1:
            return out_t[0, :batch].reshape(batch, 1)
        return out_t[:, :batch].T

    # Pure-JAX reference for validation (un-folded, row-major weights).
    def reference(self, x):
        conti = x[:, 0:2]
        h = jnp.tanh(conti @ self.w1 + self.b1)
        h = jnp.tanh(h @ self.w2 + self.b2)
        h = h @ self.w3 + self.b3
        if self.is_discr_state:
            discr = jnp.clip(x[:, 2].astype(jnp.int32), 0, self.discr_size - 1)
            h = h + self.emb[discr]
            return h @ self.wo + self.bo
        return h


# --------------------------------- main ------------------------------------ #

if __name__ == "__main__":
    key = jax.random.PRNGKey(0)
    k_conti, k_discr, k_params, k_params2, k_big = jax.random.split(key, 5)

    batch = 8
    state_size = 3          # 2 continuous features + 1 discrete code
    out_size = 1
    discr_size = 16
    hidde_size = 32

    conti_x = jax.random.normal(k_conti, (batch, 2), jnp.float32)
    discr_x = jax.random.randint(k_discr, (batch, 1), 0, discr_size).astype(
        jnp.float32)
    x = jnp.concatenate([conti_x, discr_x], axis=1)     # (B, 3)

    # Discrete-state path
    net_d = CriticNetPallas(state_size, out_size, (True, discr_size),
                            hidde_size, key=k_params)
    out_d = jax.block_until_ready(net_d(x))
    ref_d = net_d.reference(x)
    assert out_d.shape == (batch, out_size)
    assert jnp.allclose(out_d, ref_d, atol=1e-4, rtol=1e-4), (out_d, ref_d)

    # Continuous-only path
    net_c = CriticNetPallas(state_size, out_size, (False, None),
                            hidde_size, key=k_params2)
    out_c = jax.block_until_ready(net_c(x))
    ref_c = net_c.reference(x)
    assert out_c.shape == (batch, out_size)
    assert jnp.allclose(out_c, ref_c, atol=1e-4, rtol=1e-4), (out_c, ref_c)

    # Multi-tile / padding path (forces grid=(3,) with tile_b=128, b_pad=384).
    batch2 = 300
    conti_x2 = jax.random.normal(k_big, (batch2, 2), jnp.float32)
    discr_x2 = jax.random.randint(k_big, (batch2, 1), 0, discr_size).astype(
        jnp.float32)
    x2 = jnp.concatenate([conti_x2, discr_x2], axis=1)
    net_d2 = CriticNetPallas(state_size, out_size, (True, discr_size),
                             hidde_size, key=k_params, tile_b_max=128)
    out_d2 = jax.block_until_ready(net_d2(x2))
    ref_d2 = net_d2.reference(x2)
    assert out_d2.shape == (batch2, out_size)
    assert jnp.allclose(out_d2, ref_d2, atol=1e-4, rtol=1e-4)

    print("KERNEL_OK")
</pallas_src>

<mosaic_0001>
module attributes {stable_mosaic.version = 11 : i64} {
  func.func @_critic_discr_kernel(%arg0: i32, %arg1: memref<3x128xf32, #tpu.memory_space<vmem>>, %arg2: memref<32x3xf32, #tpu.memory_space<vmem>>, %arg3: memref<32x1xf32, #tpu.memory_space<vmem>>, %arg4: memref<32x32xf32, #tpu.memory_space<vmem>>, %arg5: memref<32x1xf32, #tpu.memory_space<vmem>>, %arg6: memref<1x32xf32, #tpu.memory_space<vmem>>, %arg7: memref<1x16xf32, #tpu.memory_space<vmem>>, %arg8: memref<1x1xf32, #tpu.memory_space<vmem>>, %arg9: memref<1x128xf32, #tpu.memory_space<vmem>>) attributes {dimension_semantics = [#tpu.dimension_semantics<parallel>], iteration_bounds = array<i64: 1>, scalar_prefetch = 0 : i64, scratch_operands = 0 : i64, tpu.core_type = #tpu.core_type<tc>, window_params = [{transform_indices = @transform_0, window_bounds = array<i64: 3, 128>}, {pipeline_mode = #tpu.pipeline_mode<synchronous>, transform_indices = @transform_1, window_bounds = array<i64: 32, 3>}, {pipeline_mode = #tpu.pipeline_mode<synchronous>, transform_indices = @transform_2, window_bounds = array<i64: 32, 1>}, {pipeline_mode = #tpu.pipeline_mode<synchronous>, transform_indices = @transform_3, window_bounds = array<i64: 32, 32>}, {pipeline_mode = #tpu.pipeline_mode<synchronous>, transform_indices = @transform_4, window_bounds = array<i64: 32, 1>}, {pipeline_mode = #tpu.pipeline_mode<synchronous>, transform_indices = @transform_5, window_bounds = array<i64: 1, 32>}, {pipeline_mode = #tpu.pipeline_mode<synchronous>, transform_indices = @transform_6, window_bounds = array<i64: 1, 16>}, {pipeline_mode = #tpu.pipeline_mode<synchronous>, transform_indices = @transform_7, window_bounds = array<i64: 1, 1>}, {transform_indices = @transform_8, window_bounds = array<i64: 1, 128>}]} {
    %c0 = arith.constant 0 : index
    %c0_0 = arith.constant 0 : index
    %0 = vector.load %arg1[%c0, %c0_0] : memref<3x128xf32, #tpu.memory_space<vmem>>, vector<3x128xf32>
    %c0_1 = arith.constant 0 : index
    %c0_2 = arith.constant 0 : index
    %1 = vector.load %arg2[%c0_1, %c0_2] : memref<32x3xf32, #tpu.memory_space<vmem>>, vector<32x3xf32>
    %cst = arith.constant dense<0.000000e+00> : vector<32x128xf32>
    %2 = tpu.matmul %1, %0, %cst {dimension_numbers = #tpu.dot_dimension_numbers<[1], [0], [0], [1], [0, 0, 1, 1], [], []>} : vector<32x3xf32>, vector<3x128xf32>, vector<32x128xf32> -> vector<32x128xf32>
    %c0_3 = arith.constant 0 : index
    %c0_4 = arith.constant 0 : index
    %3 = vector.load %arg3[%c0_3, %c0_4] : memref<32x1xf32, #tpu.memory_space<vmem>>, vector<32x1xf32>
    %4 = vector.broadcast %3 : vector<32x1xf32> to vector<32x128xf32>
    %5 = arith.addf %2, %4 : vector<32x128xf32>
    %6 = math.tanh %5 : vector<32x128xf32>
    %c0_5 = arith.constant 0 : index
    %c0_6 = arith.constant 0 : index
    %7 = vector.load %arg4[%c0_5, %c0_6] : memref<32x32xf32, #tpu.memory_space<vmem>>, vector<32x32xf32>
    %cst_7 = arith.constant dense<0.000000e+00> : vector<32x128xf32>
    %8 = tpu.matmul %7, %6, %cst_7 {dimension_numbers = #tpu.dot_dimension_numbers<[1], [0], [0], [1], [0, 0, 1, 1], [], []>} : vector<32x32xf32>, vector<32x128xf32>, vector<32x128xf32> -> vector<32x128xf32>
    %c0_8 = arith.constant 0 : index
    %c0_9 = arith.constant 0 : index
    %9 = vector.load %arg5[%c0_8, %c0_9] : memref<32x1xf32, #tpu.memory_space<vmem>>, vector<32x1xf32>
    %10 = vector.broadcast %9 : vector<32x1xf32> to vector<32x128xf32>
    %11 = arith.addf %8, %10 : vector<32x128xf32>
    %12 = math.tanh %11 : vector<32x128xf32>
    %c0_10 = arith.constant 0 : index
    %c0_11 = arith.constant 0 : index
    %13 = vector.load %arg6[%c0_10, %c0_11] : memref<1x32xf32, #tpu.memory_space<vmem>>, vector<1x32xf32>
    %cst_12 = arith.constant dense<0.000000e+00> : vector<1x128xf32>
    %14 = tpu.matmul %13, %12, %cst_12 {dimension_numbers = #tpu.dot_dimension_numbers<[1], [0], [0], [1], [0, 0, 1, 1], [], []>} : vector<1x32xf32>, vector<32x128xf32>, vector<1x128xf32> -> vector<1x128xf32>
    %15 = vector.extract_strided_slice %0 {offsets = [2, 0], sizes = [1, 128], strides = [1, 1]} : vector<3x128xf32> to vector<1x128xf32>
    %16 = arith.fptosi %15 : vector<1x128xf32> to vector<1x128xi32>
    %c0_i32 = arith.constant 0 : i32
    %c15_i32 = arith.constant 15 : i32
    %17 = vector.broadcast %c0_i32 : i32 to vector<1x128xi32>
    %18 = arith.maxsi %17, %16 : vector<1x128xi32>
    %19 = vector.broadcast %c15_i32 : i32 to vector<1x128xi32>
    %20 = arith.minsi %19, %18 : vector<1x128xi32>
    %21 = tpu.iota {dimensions = array<i32: 0>} : vector<16x128xi32>
    %22 = vector.broadcast %20 : vector<1x128xi32> to vector<16x128xi32>
    %23 = arith.cmpi eq, %21, %22 : vector<16x128xi32>
    %24 = arith.extui %23 : vector<16x128xi1> to vector<16x128xi32>
    %25 = arith.sitofp %24 : vector<16x128xi32> to vector<16x128xf32>
    %c0_13 = arith.constant 0 : index
    %c0_14 = arith.constant 0 : index
    %26 = vector.load %arg7[%c0_13, %c0_14] : memref<1x16xf32, #tpu.memory_space<vmem>>, vector<1x16xf32>
    %cst_15 = arith.constant dense<0.000000e+00> : vector<1x128xf32>
    %27 = tpu.matmul %26, %25, %cst_15 {dimension_numbers = #tpu.dot_dimension_numbers<[1], [0], [0], [1], [0, 0, 1, 1], [], []>} : vector<1x16xf32>, vector<16x128xf32>, vector<1x128xf32> -> vector<1x128xf32>
    %28 = arith.addf %14, %27 : vector<1x128xf32>
    %c0_16 = arith.constant 0 : index
    %c0_17 = arith.constant 0 : index
    %29 = vector.load %arg8[%c0_16, %c0_17] : memref<1x1xf32, #tpu.memory_space<vmem>>, vector<1x1xf32>
    %30 = vector.broadcast %29 : vector<1x1xf32> to vector<1x128xf32>
    %31 = arith.addf %28, %30 : vector<1x128xf32>
    %c0_18 = arith.constant 0 : index
    %c0_19 = arith.constant 0 : index
    %32 = vector.load %arg9[%c0_18, %c0_19] : memref<1x128xf32, #tpu.memory_space<vmem>>, vector<1x128xf32>
    tpu.vector_store %arg9[%c0_18, %c0_19], %31 {strides = array<i32>} : memref<1x128xf32, #tpu.memory_space<vmem>>, vector<1x128xf32>,
    return
  }
  func.func @transform_0(%arg0: i32) -> (i32, i32) {
    %c0_i32 = arith.constant 0 : i32
    %c0_i32_0 = arith.constant 0 : i32
    return %c0_i32, %arg0 : i32, i32
  }
  func.func @transform_1(%arg0: i32) -> (i32, i32) {
    %c0_i32 = arith.constant 0 : i32
    %c0_i32_0 = arith.constant 0 : i32
    %c0_i32_1 = arith.constant 0 : i32
    return %c0_i32, %c0_i32_0 : i32, i32
  }
  func.func @transform_2(%arg0: i32) -> (i32, i32) {
    %c0_i32 = arith.constant 0 : i32
    %c0_i32_0 = arith.constant 0 : i32
    %c0_i32_1 = arith.constant 0 : i32
    return %c0_i32, %c0_i32_0 : i32, i32
  }
  func.func @transform_3(%arg0: i32) -> (i32, i32) {
    %c0_i32 = arith.constant 0 : i32
    %c0_i32_0 = arith.constant 0 : i32
    %c0_i32_1 = arith.constant 0 : i32
    return %c0_i32, %c0_i32_0 : i32, i32
  }
  func.func @transform_4(%arg0: i32) -> (i32, i32) {
    %c0_i32 = arith.constant 0 : i32
    %c0_i32_0 = arith.constant 0 : i32
    %c0_i32_1 = arith.constant 0 : i32
    return %c0_i32, %c0_i32_0 : i32, i32
  }
  func.func @transform_5(%arg0: i32) -> (i32, i32) {
    %c0_i32 = arith.constant 0 : i32
    %c0_i32_0 = arith.constant 0 : i32
    %c0_i32_1 = arith.constant 0 : i32
    return %c0_i32, %c0_i32_0 : i32, i32
  }
  func.func @transform_6(%arg0: i32) -> (i32, i32) {
    %c0_i32 = arith.constant 0 : i32
    %c0_i32_0 = arith.constant 0 : i32
    %c0_i32_1 = arith.constant 0 : i32
    return %c0_i32, %c0_i32_0 : i32, i32
  }
  func.func @transform_7(%arg0: i32) -> (i32, i32) {
    %c0_i32 = arith.constant 0 : i32
    %c0_i32_0 = arith.constant 0 : i32
    %c0_i32_1 = arith.constant 0 : i32
    return %c0_i32, %c0_i32_0 : i32, i32
  }
  func.func @transform_8(%arg0: i32) -> (i32, i32) {
    %c0_i32 = arith.constant 0 : i32
    %c0_i32_0 = arith.constant 0 : i32
    return %c0_i32, %arg0 : i32, i32
  }
}

</mosaic_0001>

<bundles_post_ra>
// kernel: tpu_custom_call.1
= control target key start
LH: loop header
LB: loop body
LE: loop exit
PB: predicated region body
PF: predicated region fallthrough
CT: control target
= control target key end

     0   :  { %s770_s0 = inlined_call_operand.vmem [shape: f32[3,128], index: 0, kind: input, shape index: {}]   ;;  %s771_s1 = inlined_call_operand.vmem [shape: f32[32,3], index: 1, kind: input, shape index: {}]   ;;  %s772_s2 = inlined_call_operand.vmem [shape: f32[32,1], index: 2, kind: input, shape index: {}]   ;;  %s773_s3 = inlined_call_operand.vmem [shape: f32[32,32], index: 3, kind: input, shape index: {}]   ;;  %s774_s4 = inlined_call_operand.vmem [shape: f32[32,1], index: 4, kind: input, shape index: {}]   ;;  %s775_s5 = inlined_call_operand.vmem [shape: f32[1,32], index: 5, kind: input, shape index: {}]   ;;  %s776_s6 = inlined_call_operand.vmem [shape: f32[1,16], index: 6, kind: input, shape index: {}]   ;;  %s777_s7 = inlined_call_operand.<no memory space> [shape: f32[1,1], index: 7, kind: input, shape index: {}]   ;;  %s778_s8 = inlined_call_operand.hbm [shape: f32[1,128], index: 8, kind: output, shape index: {}]  }
   0x1   :  { %v13_v0 = vstv %s777_s7 }
   0x2   :  { %14 = vst [vmem:[#allocation2] sm:$0x1] %v13_v0 }
   0x3   :  { %v690_v1 = vld [vmem:[%s770_s0] sm:$0x7]  ;;  %vm74_vm0 = vcmask 1042432   ;;  %vm61_vm1 = vcmask 23552   ;;  %v34_v3 = vld [vmem:[%s771_s1 + $0x8] sm:$0xff]  ;;  %v35_v4 = vld [vmem:[%s771_s1 + $0x10] sm:$0xff] }
   0x4   :  { %v33_v2 = vld [vmem:[%s771_s1] sm:$0xff]  ;;  %526 = vmatprep.subr.msk.mxu0 %vm74_vm0, %v690_v1  ;;  %v633_v6 = vmov 0   ;;  %v39_v7 = vld [vmem:[%s772_s2 + $0x10] sm:$0xff]  ;;  %v36_v8 = vld [vmem:[%s771_s1 + $0x18] sm:$0xff] }
   0x5   :  { %528 = vmatprep.mubr.msk.f32.mxu0 %vm61_vm1, %v33_v2  ;;  %v37_v5 = vld [vmem:[%s772_s2] sm:$0xff]  ;;  %527 = vmatpush3.msk.msra.mxu0 %vm74_vm0, %v690_v1  ;;  %v38_v9 = vld [vmem:[%s772_s2 + $0x8] sm:$0xff] }
   0x6   :  { %591 = vset.pattern.permute.xlu0 %v633_v6  ;;  %529 = vmatmul.mubr.msk.f32.vlgmr.msra.gmra.mrb[0].mxu0 %vm61_vm1, %v34_v3 }
   0x7   :  { %43 = vperm.xlu0 %591, %v37_v5   ;;  %531 = vmatprep.mubr.msk.f32.mxu0 %vm61_vm1, %v35_v4 }
   0x8   :  { %592 = vset.pattern.permute.xlu1 %v633_v6 }
   0x9   :  { %15 = vsyncpa [#allocation4], 0  ;;  %53 = vperm.xlu1 %592, %v39_v7   ;;  %v40_v10 = vld [vmem:[%s772_s2 + $0x18] sm:$0xff]  ;;  %v171_v11 = vld [vmem:[%s774_s4] sm:$0xff]  ;;  %vm195_vm2 = vcmask 261120   ;;  %v583_v38 = vtrunc.f32 %v690_v1  ;;  %v303_v40 = vlaneseq  ;;  %v634_v47 = vmov 0.0|0.0  }
   0xa   :  { %532 = vmatmul.mubr.msk.f32.gmra.mrb[2].mxu0 %vm61_vm1, %v36_v8  ;;  %v172_v12 = vld [vmem:[%s774_s4 + $0x8] sm:$0xff]  ;;  %v173_v13 = vld [vmem:[%s774_s4 + $0x10] sm:$0xff]  ;;  %v174_v14 = vld [vmem:[%s774_s4 + $0x18] sm:$0xff]  ;;  %574 = vmatprep.subr.bf16.mxu0 %v634_v47  ;;  %v635_v48 = vmov 1.0|1.0   ;;  %vm317_vm8 = vcmask 130048  }
   0xb   :  { %48 = vperm.xlu0 %591, %v38_v9   ;;  %v464_v15 = vld [vmem:[#allocation2] sm:$0x1]  ;;  %v168_v35 = vld [vmem:[%s773_s3 + $0x8] sm:$0xff]  ;;  %v169_v36 = vld [vmem:[%s773_s3 + $0x10] sm:$0xff]  ;;  %v584_v39 = vcvt.f32.s32 %v583_v38  ;;  %v304_v42 = vshrl.u32 %v303_v40, 7  ;;  %vm636_vm9 = vmmov 0  }
   0xc   :  { %v167_v16 = vld [vmem:[%s773_s3] sm:$0xff]  ;;  %v170_v37 = vld [vmem:[%s773_s3 + $0x18] sm:$0xff]  ;;  %v637_v50 = vmov 0.0   ;;  %s638_s14 = smov [#allocation3]  }
   0xd   :  { %58 = vperm.xlu1 %592, %v40_v10   ;;  %542 = vmatprep.mubr.msk.f32.mxu1 %vm195_vm2, %v167_v16  ;;  %vm299_vm3 = vcmp.gt.s32.totalorder %v584_v39, 0  ;;  %v308_v43 = vsub.s32 2, %v304_v42  ;;  %v305_v46 = vadd.s32 8, %v304_v42  ;;  %v316_v49 = vld [vmem:[%s776_s6] sm:$0x1]  ;;  %v472_v8 = vsub.s32 0, %v304_v42 }
   0xe   :  { %v300_v41 = vsel %vm299_vm3, %v584_v39, 0  ;;  %552 = vmatprep.mubr.msk.f32.mxu0 %vm636_vm9, %v637_v50  ;;  %v297_v5 = vld [vmem:[%s775_s5] sm:$0x1]  ;;  %s482_s15 = sshll.u32 %s638_s14, 4  ;;  %s483_s15 = int_to_ptr.vmem [resolvable:$true] %s482_s15 }
   0xf   :  { %177 = vperm.xlu0 %591, %v171_v11   ;;  %vm301_vm4 = vcmp.lt.s32.totalorder %v300_v41, 15  ;;  %s609_s16 = scalar_lea.vmem %s483_s15, 16  ;;  %s613_s17 = scalar_lea.vmem %s483_s15, 32 }
  0x10   :  { %v302_v44 = vsel %vm301_vm4, %v300_v41, 15  ;;  %p610_p0 = scmp.ne.s32.totalorder %s483_s15, %s609_s16  ;;  %p614_p1 = scmp.lt.s32.totalorder %s483_s15, %s483_s15 }
  0x11   :  { %182 = vperm.xlu1 %592, %v172_v12   ;;  %v309_v45 = vrot.slane %v302_v44, %v308_v43  ;;  %p615_p2 = scmp.lt.s32.totalorder %s613_s17, %s609_s16 }
  0x13   :  { %187 = vperm.xlu0 %591, %v173_v13   ;;  %vm310_vm5 = vcmp.eq.s32.totalorder %v304_v42, %v309_v45  ;;  %vm311_vm6 = vcmp.eq.s32.totalorder %v305_v46, %v309_v45  ;;  %p616_p3 = por %p615_p2, %p614_p1 }
  0x14   :  { %vm575_vm7 = vmpackc.low %vm311_vm6, %vm310_vm5 }
  0x15   :  { %192 = vperm.xlu1 %592, %v174_v14   ;;  %576 = vmatpush3.bf16.msk.msra.mxu0 %vm575_vm7, %v635_v48  ;;  %p617_p4 = pnand %p616_p3, %p610_p0 }
  0x17   :  { %467 = vperm.xlu0 %591, %v464_v15  }
  0x18   :  { %553 = vmatmul.mubr.msk.f32.vlgmr.msra.gmra.mrb[4].mxu0 %vm317_vm8, %v316_v49 }
  0x86   :  { %v44_v17 = vpop.permute.xlu0 %43 }
  0x88   :  { %v54_v18 = vpop.permute.xlu1 %53 }
  0x8a   :  { %v49_v19 = vpop.permute.xlu0 %48 }
  0x8c   :  { %v59_v24 = vpop.permute.xlu1 %58 }
  0x8e   :  { %v178_v52 = vpop.permute.xlu0 %177 }
  0x90   :  { %v183_v51 = vpop.permute.xlu1 %182 }
  0x92   :  { %v188_v59 = vpop.permute.xlu0 %187 }
  0x94   :  { %v193_v57 = vpop.permute.xlu1 %192 }
  0x96   :  { %v468_v9 = vpop.permute.xlu0 %467 }
  0x97   :  { %v473_v11 = vrot.slane %v468_v9, %v472_v8 }
  0xd9   :  { %v530_v20 = vpop.f32.mrb[0].mxu0 }
  0xda   :  { %v150_v21 = vadd.f32 %v530_v20, %v49_v19  ;;  %v144_v22 = vpop.f32.mrb[1].mxu0 }
  0xdb   :  { %v145_v23 = vadd.f32 %v144_v22, %v44_v17 }
  0xdc   :  { %593 = vtanh.f32 %v150_v21 }
  0xdd   :  { %595 = vtanh.f32 %v145_v23  ;;  %v533_v25 = vpop.f32.mrb[2].mxu0 }
  0xde   :  { %v160_v26 = vadd.f32 %v533_v25, %v59_v24  ;;  %v154_v27 = vpop.f32.mrb[3].mxu0 }
  0xdf   :  { %v155_v28 = vadd.f32 %v154_v27, %v54_v18 }
  0xe0   :  { %597 = vtanh.f32 %v160_v26 }
  0xe1   :  { %599 = vtanh.f32 %v155_v28 }
  0xe6   :  { %v594_v29 = vpop.eup %593 }
  0xe7   :  { %v596_v30 = vpop.eup %595 }
  0xe8   :  { %v566_v31 = vpack.c.bf16 %v594_v29, %v596_v30 }
  0xea   :  { %v598_v32 = vpop.eup %597  ;;  %567 = vmatprep.subr.bf16.mxu1 %v566_v31 }
  0xeb   :  { %v600_v33 = vpop.eup %599  ;;  %569 = vmatpush3.bf16.msra.mxu1 %v566_v31  ;;  %v387_v6 = vpop.f32.mrb[4].mxu0 }
  0xec   :  { %v570_v34 = vpack.c.bf16 %v598_v32, %v600_v33  ;;  %v554_v7 = vpop.f32.mrb[5].mxu0 }
  0xee   :  { %571 = vmatprep.subr.bf16.mxu1 %v570_v34 }
  0xef   :  { %573 = vmatpush3.bf16.msra.mxu1 %v570_v34 }
  0xf0   :  { %577 = vmatprep.subr.bf16.mxu1 %v634_v47 }
  0xf2   :  { %543 = vmatmul.mubr.msk.f32.vlgmr.msra.gmra.mrb[0].mxu1 %vm195_vm2, %v168_v35 }
  0xf3   :  { %545 = vmatprep.mubr.msk.f32.mxu1 %vm195_vm2, %v169_v36 }
  0xf6   :  { %546 = vmatmul.mubr.msk.f32.gmra.mrb[2].mxu1 %vm195_vm2, %v170_v37 }
  0xf7   :  { %563 = vmatprep.mubr.msk.f32.mxu1 %vm636_vm9, %v637_v50 }
 0x1c5   :  { %v544_v53 = vpop.f32.mrb[0].mxu1 }
 0x1c6   :  { %v280_v54 = vadd.f32 %v544_v53, %v183_v51  ;;  %v274_v55 = vpop.f32.mrb[1].mxu1 }
 0x1c7   :  { %v275_v56 = vadd.f32 %v274_v55, %v178_v52 }
 0x1c8   :  { %601 = vtanh.f32 %v280_v54 }
 0x1c9   :  { %603 = vtanh.f32 %v275_v56  ;;  %v547_v58 = vpop.f32.mrb[2].mxu1 }
 0x1ca   :  { %v290_v60 = vadd.f32 %v547_v58, %v193_v57  ;;  %v284_v61 = vpop.f32.mrb[3].mxu1 }
 0x1cb   :  { %v285_v62 = vadd.f32 %v284_v61, %v188_v59 }
 0x1cc   :  { %605 = vtanh.f32 %v290_v60 }
 0x1cd   :  { %607 = vtanh.f32 %v285_v62 }
 0x1d2   :  { %v602_v63 = vpop.eup %601 }
 0x1d3   :  { %v604_v0 = vpop.eup %603 }
 0x1d4   :  { %v578_v1 = vpack.c.bf16 %v602_v63, %v604_v0 }
 0x1d6   :  { %v606_v2 = vpop.eup %605  ;;  %579 = vmatpush3.bf16.msra.mxu1 %v578_v1 }
 0x1d7   :  { %v608_v3 = vpop.eup %607  ;;  %580 = vmatprep.subr.bf16.mxu1 %v634_v47 }
 0x1d8   :  { %v581_v4 = vpack.c.bf16 %v606_v2, %v608_v3 }
 0x1da   :  { %582 = vmatpush3.bf16.msra.mxu1 %v581_v4 }
 0x1dd   :  { %564 = vmatmul.mubr.msk.f32.vlgmr.msra.gmra.mrb[4].mxu1 %vm195_vm2, %v297_v5 }
 0x2b0   :  { %v460_v10 = vpop.f32.mrb[4].mxu1 }
 0x2b1   :  { %v461_v12 = vadd.f32 %v460_v10, %v387_v6  ;;  %v565_v13 = vpop.f32.mrb[5].mxu1 }
 0x2b3   :  { %v474_v14 = vadd.f32 %v473_v11, %v461_v12 }
 0x2b5   :  { %475 = vst [vmem:[#allocation3] sm:$0x1] %v474_v14 }
 0x2b6   :  { %620 = shalt.err (!%p617_p4)
}
 0x2b7   :  { %s621_s19 = scalar_lea.hbm %s778_s8, 16 }
 0x2b8   :  { %p622_p5 = scmp.ne.s32.totalorder %s778_s8, %s621_s19  ;;  %p625_p6 = scmp.lt.u32.totalorder %s621_s19, %s778_s8 }
 0x2ba   :  { %p627_p7 = pnand %p625_p6, %p622_p5 }
 0x2bc   :  { %630 = shalt.err (!%p627_p7)
}
 0x2bd   :  { %485 = dma.vmem_to_hbm [thread:$0]  %s483_s15, 16, %s778_s8, [#allocation4]  }
 0x2be   :  { %631 = dma.done.wait [#allocation4], 16  }
 0x2bf   :  { %632 = vsyncadd [#allocation4], 4294967280 }
 0x2c0   :  { %489 = vsyncpa [#allocation4], 1 }

</bundles_post_ra>
